<compile_context>
chip_gen: v7x
topology: tpu7x:2x2x1
jax: 0.10.0
libtpu: 0.0.40
codegen_flags: <defaults>
</compile_context>

<pallas_src>
import functools

import jax
import jax.numpy as jnp
from jax.experimental import pallas as pl
from jax.experimental.pallas import tpu as pltpu


def net_kernel(adj_ref, x_ref, w1_ref, b1_ref, gamma_ref, beta_ref,
               mask_ref, w2_ref, b2_ref, out_ref, *, dropout_p, num_classes):
    adj = adj_ref[...]                     # (N, N)   bf16 normalized adjacency
    x = x_ref[...]                         # (N, Fin) bf16

    # ---------------- CoNet 1 (mix scalars pre-folded): one matmul ----------
    ax = jnp.dot(adj, x, preferred_element_type=jnp.float32)          # (N,Fin)
    h = jnp.dot(ax.astype(jnp.bfloat16), w1_ref[...],
                preferred_element_type=jnp.float32) + b1_ref[...]     # (N,H) f32

    # ---------------- BatchNorm1d (training-mode stats, single pass) --------
    mu = jnp.mean(h, axis=0, keepdims=True)
    var = jnp.mean(h * h, axis=0, keepdims=True) - mu * mu   # biased variance
    scale = jax.lax.rsqrt(var + 1e-5) * gamma_ref[...]       # rsqrt -> EUP
    h = (h - mu) * scale + beta_ref[...]

    # ---------------- ReLU ---------------------------------------------------
    h = jnp.maximum(h, 0.0)

    # ---------------- Dropout (mask pre-scaled by 1/(1-p) in the wrapper) ----
    if dropout_p > 0.0:
        h = h * mask_ref[...]

    # ---------------- CoNet 2 (mix scalars pre-folded): one matmul ----------
    ah = jnp.dot(adj, h.astype(jnp.bfloat16),
                 preferred_element_type=jnp.float32)                  # (N,H)
    z = jnp.dot(ah.astype(jnp.bfloat16), w2_ref[...],
                preferred_element_type=jnp.float32) + b2_ref[...]     # (N,Cpad)

    # mask padded lanes out of the softmax reduction
    col = jax.lax.broadcasted_iota(jnp.int32, z.shape, 1)
    z = jnp.where(col < num_classes, z, -1e30)

    # ---------------- log_softmax over dim 1 ---------------------------------
    zmax = jnp.max(z, axis=1, keepdims=True)
    ze = z - zmax
    lse = jnp.log(jnp.sum(jnp.exp(ze), axis=1, keepdims=True))
    out_ref[...] = ze - lse                # lane-dense (N, 128) store


def net_forward(adj_norm, x, params, *, dropout_p, rng_key=None):
    """Full Net forward in one fused Pallas call (everything resident in VMEM)."""
    n, _ = x.shape
    hid = params["w1"].shape[-1]
    c = params["w2"].shape[-1]
    c_pad = max(128, ((c + 127) // 128) * 128)   # lane-dense padded output width

    f32, bf16 = jnp.float32, jnp.bfloat16

    # Fold learned mix scalars into the GraphConv weights (exactly equivalent:
    # sum_i (m_i/s)*(AX@W_i + b_i) = AX @ (sum_i m_i/s * W_i) + sum_i m_i/s * b_i).
    mix1 = params["mix1"] / jnp.sum(params["mix1"])
    mix2 = params["mix2"] / jnp.sum(params["mix2"])
    w1_eff = jnp.tensordot(mix1, params["w1"], axes=1).astype(bf16)   # (Fin, H)
    b1_eff = jnp.tensordot(mix1, params["b1"], axes=1).astype(f32)    # (1, H)
    w2_eff = jnp.tensordot(mix2, params["w2"], axes=1).astype(bf16)   # (H, C)
    b2_eff = jnp.tensordot(mix2, params["b2"], axes=1).astype(f32)    # (1, C)

    # Pad the class dimension to a full 128-lane slab (unmasked stores).
    w2_pad = jnp.zeros((hid, c_pad), bf16).at[:, :c].set(w2_eff)
    b2_pad = jnp.zeros((1, c_pad), f32).at[:, :c].set(b2_eff)

    # Dropout keep-mask, pre-scaled by 1/(1-p).  Generated host-side because
    # pltpu.prng_seed / prng_random_bits have no CPU / interpret lowering.
    if dropout_p > 0.0:
        keep = jax.random.bernoulli(rng_key, 1.0 - dropout_p, (n, hid))
        drop_mask = keep.astype(f32) * (1.0 / (1.0 - dropout_p))
    else:
        drop_mask = jnp.ones((n, hid), f32)

    adj_bf = adj_norm.astype(bf16)          # bf16 adjacency: MXU-native, half VMEM
    x_bf = x.astype(bf16)
    gamma = params["gamma"].astype(f32)
    beta = params["beta"].astype(f32)

    operands = (adj_bf, x_bf, w1_eff, b1_eff, gamma, beta,
                drop_mask, w2_pad, b2_pad)

    # Explicit VMEM limit sized to the resident working set (+ headroom).
    resident = sum(int(a.size) * a.dtype.itemsize for a in operands)
    resident += n * c_pad * 4 + 4 * n * hid * 4        # output + intermediates
    vmem_limit = int(max(2 * resident, 8 * 1024 * 1024))

    vmem = pl.BlockSpec(memory_space=pltpu.MemorySpace.VMEM)
    kernel = functools.partial(net_kernel,
                               dropout_p=float(dropout_p), num_classes=c)

    out_pad = pl.pallas_call(
        kernel,
        out_shape=jax.ShapeDtypeStruct((n, c_pad), f32),
        in_specs=[vmem] * len(operands),
        out_specs=vmem,
        compiler_params=pltpu.CompilerParams(vmem_limit_bytes=vmem_limit),
    )(*operands)

    return out_pad[:, :c]


def _reference(adj, x, p, *, drop_mask=None):
    """Pure-JAX reference mirroring the kernel's bf16-matmul / f32-accumulate math."""
    f32, bf16 = jnp.float32, jnp.bfloat16
    mix1 = p["mix1"] / jnp.sum(p["mix1"])
    mix2 = p["mix2"] / jnp.sum(p["mix2"])
    w1e = jnp.tensordot(mix1, p["w1"], axes=1)
    b1e = jnp.tensordot(mix1, p["b1"], axes=1)
    w2e = jnp.tensordot(mix2, p["w2"], axes=1)
    b2e = jnp.tensordot(mix2, p["b2"], axes=1)

    ax = jnp.dot(adj.astype(bf16), x.astype(bf16), preferred_element_type=f32)
    h = jnp.dot(ax.astype(bf16), w1e.astype(bf16), preferred_element_type=f32) + b1e
    mu = jnp.mean(h, axis=0, keepdims=True)
    var = jnp.mean(h * h, axis=0, keepdims=True) - mu * mu
    h = (h - mu) * jax.lax.rsqrt(var + 1e-5) * p["gamma"] + p["beta"]
    h = jnp.maximum(h, 0.0)
    if drop_mask is not None:
        h = h * drop_mask
    ah = jnp.dot(adj.astype(bf16), h.astype(bf16), preferred_element_type=f32)
    z = jnp.dot(ah.astype(bf16), w2e.astype(bf16), preferred_element_type=f32) + b2e
    return jax.nn.log_softmax(z, axis=1)


if __name__ == "__main__":
    N, IN_C, HID, OUT_C = 16, 8, 32, 4
    DROPOUT_P = 0.5

    key = jax.random.PRNGKey(0)
    k_adj, k_x, k_w1, k_w2, k_drop = jax.random.split(key, 5)

    # Small synthetic undirected graph with self-loops, GCN normalization.
    a = jax.random.bernoulli(k_adj, 0.3, (N, N)).astype(jnp.float32)
    a = jnp.maximum(a, a.T)
    a = jnp.maximum(a, jnp.eye(N, dtype=jnp.float32))          # add self-loops
    deg_inv_sqrt = 1.0 / jnp.sqrt(jnp.sum(a, axis=1))
    adj_norm = deg_inv_sqrt[:, None] * a * deg_inv_sqrt[None, :]

    x = jax.random.normal(k_x, (N, IN_C), dtype=jnp.float32)

    params = {
        # CoNet layer 1: three GraphConv(in, hid)
        "w1": 0.1 * jax.random.normal(k_w1, (3, IN_C, HID), dtype=jnp.float32),
        "b1": jnp.zeros((3, 1, HID), dtype=jnp.float32),
        "mix1": jnp.ones((3,), dtype=jnp.float32),              # th.tensor([1,1,1])
        # BatchNorm1d(hid) defaults
        "gamma": jnp.ones((1, HID), dtype=jnp.float32),
        "beta": jnp.zeros((1, HID), dtype=jnp.float32),
        # CoNet layer 2: three GraphConv(hid, out)
        "w2": 0.1 * jax.random.normal(k_w2, (3, HID, OUT_C), dtype=jnp.float32),
        "b2": jnp.zeros((3, 1, OUT_C), dtype=jnp.float32),
        "mix2": jnp.ones((3,), dtype=jnp.float32),
    }

    # Correctness check (dropout disabled) against a pure-JAX reference.
    out_p0 = net_forward(adj_norm, x, params, dropout_p=0.0)
    ref_p0 = _reference(adj_norm, x, params)
    out_p0 = jax.block_until_ready(out_p0)
    assert out_p0.shape == (N, OUT_C)
    assert jnp.allclose(out_p0, ref_p0, atol=2e-3, rtol=2e-3), "mismatch vs reference"

    # Full training-mode forward (with host-generated dropout mask).
    out = net_forward(adj_norm, x, params, dropout_p=DROPOUT_P, rng_key=k_drop)
    out = jax.block_until_ready(out)
    assert out.shape == (N, OUT_C)
    assert bool(jnp.all(jnp.isfinite(out)))
    print("KERNEL_OK")
</pallas_src>

<mosaic_0001>
module attributes {stable_mosaic.version = 11 : i64} {
  func.func @net_kernel(%arg0: memref<16x16xbf16, #tpu.memory_space<vmem>>, %arg1: memref<16x8xbf16, #tpu.memory_space<vmem>>, %arg2: memref<8x32xbf16, #tpu.memory_space<vmem>>, %arg3: memref<1x32xf32, #tpu.memory_space<vmem>>, %arg4: memref<1x32xf32, #tpu.memory_space<vmem>>, %arg5: memref<1x32xf32, #tpu.memory_space<vmem>>, %arg6: memref<16x32xf32, #tpu.memory_space<vmem>>, %arg7: memref<32x128xbf16, #tpu.memory_space<vmem>>, %arg8: memref<1x128xf32, #tpu.memory_space<vmem>>, %arg9: memref<16x128xf32, #tpu.memory_space<vmem>>) attributes {dimension_semantics = [], scalar_prefetch = 0 : i64, scratch_operands = 0 : i64, tpu.core_type = #tpu.core_type<tc>} {
    %c0 = arith.constant 0 : index
    %c0_0 = arith.constant 0 : index
    %0 = vector.load %arg0[%c0, %c0_0] : memref<16x16xbf16, #tpu.memory_space<vmem>>, vector<16x16xbf16>
    %c0_1 = arith.constant 0 : index
    %c0_2 = arith.constant 0 : index
    %1 = vector.load %arg1[%c0_1, %c0_2] : memref<16x8xbf16, #tpu.memory_space<vmem>>, vector<16x8xbf16>
    %cst = arith.constant dense<0.000000e+00> : vector<16x8xf32>
    %2 = tpu.matmul %0, %1, %cst {dimension_numbers = #tpu.dot_dimension_numbers<[1], [0], [0], [1], [0, 0, 1, 1], [], []>} : vector<16x16xbf16>, vector<16x8xbf16>, vector<16x8xf32> -> vector<16x8xf32>
    %3 = arith.truncf %2 : vector<16x8xf32> to vector<16x8xbf16>
    %c0_3 = arith.constant 0 : index
    %c0_4 = arith.constant 0 : index
    %4 = vector.load %arg2[%c0_3, %c0_4] : memref<8x32xbf16, #tpu.memory_space<vmem>>, vector<8x32xbf16>
    %cst_5 = arith.constant dense<0.000000e+00> : vector<16x32xf32>
    %5 = tpu.matmul %3, %4, %cst_5 {dimension_numbers = #tpu.dot_dimension_numbers<[1], [0], [0], [1], [0, 0, 1, 1], [], []>} : vector<16x8xbf16>, vector<8x32xbf16>, vector<16x32xf32> -> vector<16x32xf32>
    %c0_6 = arith.constant 0 : index
    %c0_7 = arith.constant 0 : index
    %6 = vector.load %arg3[%c0_6, %c0_7] : memref<1x32xf32, #tpu.memory_space<vmem>>, vector<1x32xf32>
    %7 = vector.broadcast %6 : vector<1x32xf32> to vector<16x32xf32>
    %8 = arith.addf %5, %7 : vector<16x32xf32>
    %cst_8 = arith.constant dense<0.000000e+00> : vector<32xf32>
    %9 = vector.multi_reduction <add>, %8, %cst_8 [0] : vector<16x32xf32> to vector<32xf32>
    %10 = vector.shape_cast %9 : vector<32xf32> to vector<1x32xf32>
    %cst_9 = arith.constant 1.600000e+01 : f32
    %11 = vector.broadcast %cst_9 : f32 to vector<1x32xf32>
    %12 = arith.divf %10, %11 : vector<1x32xf32>
    %13 = arith.mulf %8, %8 : vector<16x32xf32>
    %cst_10 = arith.constant dense<0.000000e+00> : vector<32xf32>
    %14 = vector.multi_reduction <add>, %13, %cst_10 [0] : vector<16x32xf32> to vector<32xf32>
    %15 = vector.shape_cast %14 : vector<32xf32> to vector<1x32xf32>
    %cst_11 = arith.constant 1.600000e+01 : f32
    %16 = vector.broadcast %cst_11 : f32 to vector<1x32xf32>
    %17 = arith.divf %15, %16 : vector<1x32xf32>
    %18 = arith.mulf %12, %12 : vector<1x32xf32>
    %19 = arith.subf %17, %18 : vector<1x32xf32>
    %cst_12 = arith.constant 9.99999974E-6 : f32
    %20 = vector.broadcast %cst_12 : f32 to vector<1x32xf32>
    %21 = arith.addf %19, %20 : vector<1x32xf32>
    %22 = math.rsqrt %21 : vector<1x32xf32>
    %c0_13 = arith.constant 0 : index
    %c0_14 = arith.constant 0 : index
    %23 = vector.load %arg4[%c0_13, %c0_14] : memref<1x32xf32, #tpu.memory_space<vmem>>, vector<1x32xf32>
    %24 = arith.mulf %22, %23 : vector<1x32xf32>
    %25 = vector.broadcast %12 : vector<1x32xf32> to vector<16x32xf32>
    %26 = arith.subf %8, %25 : vector<16x32xf32>
    %27 = vector.broadcast %24 : vector<1x32xf32> to vector<16x32xf32>
    %28 = arith.mulf %26, %27 : vector<16x32xf32>
    %c0_15 = arith.constant 0 : index
    %c0_16 = arith.constant 0 : index
    %29 = vector.load %arg5[%c0_15, %c0_16] : memref<1x32xf32, #tpu.memory_space<vmem>>, vector<1x32xf32>
    %30 = vector.broadcast %29 : vector<1x32xf32> to vector<16x32xf32>
    %31 = arith.addf %28, %30 : vector<16x32xf32>
    %cst_17 = arith.constant 0.000000e+00 : f32
    %32 = vector.broadcast %cst_17 : f32 to vector<16x32xf32>
    %33 = arith.maximumf %31, %32 : vector<16x32xf32>
    %34 = arith.truncf %33 : vector<16x32xf32> to vector<16x32xbf16>
    %cst_18 = arith.constant dense<0.000000e+00> : vector<16x32xf32>
    %35 = tpu.matmul %0, %34, %cst_18 {dimension_numbers = #tpu.dot_dimension_numbers<[1], [0], [0], [1], [0, 0, 1, 1], [], []>} : vector<16x16xbf16>, vector<16x32xbf16>, vector<16x32xf32> -> vector<16x32xf32>
    %36 = arith.truncf %35 : vector<16x32xf32> to vector<16x32xbf16>
    %c0_19 = arith.constant 0 : index
    %c0_20 = arith.constant 0 : index
    %37 = vector.load %arg7[%c0_19, %c0_20] : memref<32x128xbf16, #tpu.memory_space<vmem>>, vector<32x128xbf16>
    %cst_21 = arith.constant dense<0.000000e+00> : vector<16x128xf32>
    %38 = tpu.matmul %36, %37, %cst_21 {dimension_numbers = #tpu.dot_dimension_numbers<[1], [0], [0], [1], [0, 0, 1, 1], [], []>} : vector<16x32xbf16>, vector<32x128xbf16>, vector<16x128xf32> -> vector<16x128xf32>
    %c0_22 = arith.constant 0 : index
    %c0_23 = arith.constant 0 : index
    %39 = vector.load %arg8[%c0_22, %c0_23] : memref<1x128xf32, #tpu.memory_space<vmem>>, vector<1x128xf32>
    %40 = vector.broadcast %39 : vector<1x128xf32> to vector<16x128xf32>
    %41 = arith.addf %38, %40 : vector<16x128xf32>
    %42 = tpu.iota {dimensions = array<i32: 1>} : vector<16x128xi32>
    %c4_i32 = arith.constant 4 : i32
    %43 = vector.broadcast %c4_i32 : i32 to vector<16x128xi32>
    %44 = arith.cmpi slt, %42, %43 : vector<16x128xi32>
    %cst_24 = arith.constant -1.000000e+30 : f32
    %45 = vector.broadcast %cst_24 : f32 to vector<16x128xf32>
    %46 = arith.select %44, %41, %45 : vector<16x128xi1>, vector<16x128xf32>
    %cst_25 = arith.constant dense<0xFF800000> : vector<16xf32>
    %47 = vector.multi_reduction <maximumf>, %46, %cst_25 [1] : vector<16x128xf32> to vector<16xf32>
    %48 = vector.shape_cast %47 : vector<16xf32> to vector<16x1xf32>
    %49 = vector.broadcast %48 : vector<16x1xf32> to vector<16x128xf32>
    %50 = arith.subf %46, %49 : vector<16x128xf32>
    %51 = math.exp %50 : vector<16x128xf32>
    %cst_26 = arith.constant dense<0.000000e+00> : vector<16xf32>
    %52 = vector.multi_reduction <add>, %51, %cst_26 [1] : vector<16x128xf32> to vector<16xf32>
    %53 = vector.shape_cast %52 : vector<16xf32> to vector<16x1xf32>
    %54 = math.log %53 : vector<16x1xf32>
    %55 = vector.broadcast %54 : vector<16x1xf32> to vector<16x128xf32>
    %56 = arith.subf %50, %55 : vector<16x128xf32>
    %c0_27 = arith.constant 0 : index
    %c0_28 = arith.constant 0 : index
    %57 = vector.load %arg9[%c0_27, %c0_28] : memref<16x128xf32, #tpu.memory_space<vmem>>, vector<16x128xf32>
    tpu.vector_store %arg9[%c0_27, %c0_28], %56 {strides = array<i32>} : memref<16x128xf32, #tpu.memory_space<vmem>>, vector<16x128xf32>,
    return
  }
}

</mosaic_0001>

<bundles_post_ra>
// kernel: tpu_custom_call.1
= control target key start
LH: loop header
LB: loop body
LE: loop exit
PB: predicated region body
PF: predicated region fallthrough
CT: control target
= control target key end

     0   :  { %14 = vsyncpa [#allocation3], 0  ;;  %s705_s0 = inlined_call_operand.hbm [shape: bf16[16,16], index: 0, kind: input, shape index: {}]   ;;  %s706_s1 = inlined_call_operand.vmem [shape: bf16[16,8], index: 1, kind: input, shape index: {}]   ;;  %s707_s2 = inlined_call_operand.hbm [shape: bf16[8,32], index: 2, kind: input, shape index: {}]   ;;  %s708_s3 = inlined_call_operand.vmem [shape: f32[1,32], index: 3, kind: input, shape index: {}]   ;;  %s709_s4 = inlined_call_operand.vmem [shape: f32[1,32], index: 4, kind: input, shape index: {}]   ;;  %s710_s5 = inlined_call_operand.hbm [shape: f32[1,32], index: 5, kind: input, shape index: {}]   ;;  %s711_s6 = inlined_call_operand.vmem [shape: f32[16,32], index: 6, kind: input, shape index: {}]   ;;  %s712_s7 = inlined_call_operand.vmem [shape: bf16[32,128], index: 7, kind: input, shape index: {}]   ;;  %s713_s8 = inlined_call_operand.vmem [shape: f32[1,128], index: 8, kind: input, shape index: {}]   ;;  %s714_s9 = inlined_call_operand.hbm [shape: f32[16,128], index: 9, kind: output, shape index: {}]  }
   0x1   :  { %15 = vsyncpa [#allocation6], 0 }
   0x2   :  { %16 = vsyncpa [#allocation4], 0  ;;  %s557_s30 = smov [#allocation5]   ;;  %s558_s11 = smov [#allocation2]  }
   0x3   :  { %s37_s10 = sshll.u32 %s557_s30, 4  ;;  %s22_s12 = sshll.u32 %s558_s11, 4  ;;  %s38_s10 = int_to_ptr.vmem [resolvable:$true] %s37_s10  ;;  %s617_s12 = int_to_ptr.vmem [resolvable:$true] %s22_s12 }
   0x4   :  { %s463_s14 = scalar_lea.hbm %s707_s2, 64 }
   0x5   :  { %p464_p0 = scmp.ne.s32.totalorder %s707_s2, %s463_s14  ;;  %p467_p1 = scmp.lt.u32.totalorder %s463_s14, %s707_s2 }
   0x7   :  { %p469_p2 = pnand %p467_p1, %p464_p0 }
   0x9   :  { %472 = shalt.err (!%p469_p2)
}
   0xa   :  { %s473_s19 = scalar_lea.vmem %s38_s10, 64  ;;  %p478_p4 = scmp.lt.s32.totalorder %s38_s10, %s38_s10 }
   0xb   :  { %p474_p3 = scmp.ne.s32.totalorder %s38_s10, %s473_s19  ;;  %p479_p5 = scmp.lt.s32.totalorder %s473_s19, %s473_s19 }
   0xd   :  { %p480_p6 = por %p479_p5, %p478_p4 }
   0xf   :  { %p481_p7 = pnand %p480_p6, %p474_p3 }
  0x11   :  { %484 = shalt.err (!%p481_p7)
}
  0x12   :  { %40 = dma.hbm_to_vmem [thread:$0]  %s707_s2, 64, %s38_s10, [#allocation6]  }
  0x13   :  { %s485_s24 = scalar_lea.hbm %s705_s0, 128 }
  0x14   :  { %p486_p8 = scmp.ne.s32.totalorder %s705_s0, %s485_s24  ;;  %p489_p9 = scmp.lt.u32.totalorder %s485_s24, %s705_s0 }
  0x16   :  { %p491_p10 = pnand %p489_p9, %p486_p8 }
  0x18   :  { %494 = shalt.err (!%p491_p10)
}
  0x19   :  { %s495_s29 = scalar_lea.vmem %s617_s12, 128  ;;  %p500_p12 = scmp.lt.s32.totalorder %s617_s12, %s617_s12 }
  0x1a   :  { %p496_p11 = scmp.ne.s32.totalorder %s617_s12, %s495_s29  ;;  %p501_p13 = scmp.lt.s32.totalorder %s495_s29, %s495_s29 }
  0x1c   :  { %p502_p0 = por %p501_p13, %p500_p12 }
  0x1e   :  { %p503_p1 = pnand %p502_p0, %p496_p11 }
  0x20   :  { %506 = shalt.err (!%p503_p1)
}
  0x21   :  { %s559_s2 = smov 64   ;;  %s560_s30 = smov 4  }
  0x22   :  { %28 = dma.hbm_to_vmem [thread:$0]  %s705_s0, 128, %s617_s12, [#allocation3], %s559_s2, %s559_s2, %s560_s30  }
  0x23   :  { %s561_s6 = smov [#allocation7]   ;;  %s507_s16 = scalar_lea.hbm %s710_s5, 16 }
  0x24   :  { %s51_s13 = sshll.u32 %s561_s6, 4  ;;  %p508_p2 = scmp.ne.s32.totalorder %s710_s5, %s507_s16  ;;  %s52_s13 = int_to_ptr.vmem [resolvable:$true] %s51_s13 }
  0x25   :  { %p511_p3 = scmp.lt.u32.totalorder %s507_s16, %s710_s5 }
  0x27   :  { %p513_p4 = pnand %p511_p3, %p508_p2 }
  0x29   :  { %516 = shalt.err (!%p513_p4)
}
  0x2a   :  { %s517_s21 = scalar_lea.vmem %s52_s13, 16  ;;  %s521_s0 = scalar_lea.vmem %s52_s13, 32 }
  0x2b   :  { %p518_p5 = scmp.ne.s32.totalorder %s52_s13, %s517_s21  ;;  %p522_p6 = scmp.lt.s32.totalorder %s52_s13, %s52_s13 }
  0x2c   :  { %p523_p7 = scmp.lt.s32.totalorder %s521_s0, %s517_s21 }
  0x2e   :  { %p524_p8 = por %p523_p7, %p522_p6 }
  0x30   :  { %p525_p9 = pnand %p524_p8, %p518_p5 }
  0x32   :  { %528 = shalt.err (!%p525_p9)
}
  0x33   :  { %54 = dma.hbm_to_vmem [thread:$0]  %s710_s5, 16, %s52_s13, [#allocation6]  }
  0x34   :  { %551 = dma.done.wait [#allocation3], 128  }
  0x35   :  { %552 = vsyncadd [#allocation3], 4294967168 }
  0x36   :  { %553 = dma.done.wait [#allocation6], 80  }
  0x37   :  { %554 = vsyncadd [#allocation6], 4294967216  ;;  %v562_v0 = vmov 0.0   ;;  %vm563_vm0 = vmmov 0   ;;  %v449_v1 = vld [vmem:[%s706_s1] sm:$0xff]   ;;  %vm86_vm1 = vcmask 130048   ;;  %v221_v45 = vlaneseq }
  0x38   :  { %413 = vmatprep.subr.bf16.mxu0 %v562_v0  ;;  %415 = vmatprep.mubr.msk.bf16.mxu0 %vm563_vm0, %v562_v0  ;;  %v665_v2 = vld [vmem:[#allocation2] sm:$0xff]   ;;  %v132_v3 = vld [vmem:[#allocation5] sm:$0xf]  ;;  %vm144_vm2 = vcmask 1043456   ;;  %vm140_vm3 = vcmask 64512   ;;  %vm189_vm4 = vcmask 261120  }
  0x39   :  { %419 = vmatprep.subr.bf16.mxu1 %v562_v0  ;;  %421 = vmatprep.mubr.msk.bf16.mxu1 %vm563_vm0, %v562_v0  ;;  %v146_v4 = vsel %vm144_vm2, %v132_v3, 0  ;;  %v451_v10 = vld [vmem:[%s712_s7] sm:$0xff]   ;;  %v222_v46 = vshrl.u32 %v221_v45, 7  ;;  %v398_v52 = vld [vmem:[#allocation7] ss:$0 sm:$0xff]  ;;  %v349_v3 = vand.u32 127, %v221_v45 }
  0x3a   :  { %414 = vmatpush3.bf16.msra.mxu0 %v449_v1  ;;  %420 = vmatpush3.bf16.msra.mxu1 %v146_v4  ;;  %v396_v11 = vld [vmem:[%s708_s3] ss:$0 sm:$0xff]  ;;  %v452_v60 = vld [vmem:[%s712_s7 + $0x8] sm:$0xff]   ;;  %s564_s7 = smov [#allocation8]  }
  0x3b   :  { %425 = vmatprep.subr.bf16.mxu0 %v562_v0  ;;  %431 = vmatprep.subr.bf16.mxu1 %v562_v0  ;;  %v217_v47 = vld [vmem:[%s709_s4] sm:$0x1]  ;;  %v223_v48 = vsub.s32 0, %v222_v46  ;;  %vm350_vm5 = vcmp.lt.s32.totalorder %v349_v3, 4 }
  0x3c   :  { %v400_v4 = vld [vmem:[%s713_s8] ss:$0 sm:$0xff]  ;;  %s380_s8 = sshll.u32 %s564_s7, 4  ;;  %s381_s8 = int_to_ptr.vmem [resolvable:$true] %s380_s8 }
  0x3d   :  { %416 = vmatmul.mubr.msk.bf16.vlgmr.msra.gmra.mrb[0].mxu0 %vm86_vm1, %v665_v2  ;;  %s529_s30 = scalar_lea.vmem %s381_s8, 256  ;;  %p534_p11 = scmp.lt.s32.totalorder %s381_s8, %s381_s8 }
  0x3e   :  { %427 = vmatprep.mubr.msk.bf16.mxu0 %vm563_vm0, %v562_v0  ;;  %p530_p10 = scmp.ne.s32.totalorder %s381_s8, %s529_s30  ;;  %p535_p12 = scmp.lt.s32.totalorder %s529_s30, %s529_s30 }
  0x40   :  { %p536_p13 = por %p535_p12, %p534_p11 }
  0x42   :  { %p537_p0 = pnand %p536_p13, %p530_p10 }
 0x110   :  { %v124_v5 = vpop.f32.mrb[0].mxu0 }
 0x111   :  { %v417_v6 = vpop.f32.mrb[1].mxu0 }
 0x112   :  { %v127_v7 = vpop.f32.mrb[2].mxu0 }
 0x113   :  { %v131_v8 = vpack.c.bf16 %v127_v7, %v124_v5  ;;  %v418_v9 = vpop.f32.mrb[3].mxu0 }
 0x115   :  { %422 = vmatmul.mubr.msk.bf16.vlgmr.msra.gmra.mrb[0].mxu1 %vm140_vm3, %v131_v8 }
 0x116   :  { %435 = vmatprep.mubr.msk.bf16.mxu1 %vm563_vm0, %v562_v0  ;;  %432 = vmatpush3.bf16.msra.mxu1 %v451_v10 }
 0x117   :  { %433 = vmatprep.subr.bf16.mxu1 %v562_v0 }
 0x11a   :  { %434 = vmatpush3.bf16.msra.mxu1 %v452_v60 }
 0x1e8   :  { %v182_v12 = vpop.f32.mrb[0].mxu1 }
 0x1e9   :  { %v183_v13 = vadd.f32 %v396_v11, %v182_v12  ;;  %v423_v14 = vpop.f32.mrb[1].mxu1 }
 0x1ea   :  { %v185_v15 = vpop.f32.mrb[2].mxu1 }
 0x1eb   :  { %v201_v16 = vmul.f32 %v183_v13, %v183_v13  ;;  %v186_v17 = vadd.f32 %v396_v11, %v185_v15  ;;  %v424_v18 = vpop.f32.mrb[3].mxu1  ;;  %v190_v19 = vsel %vm189_vm4, %v183_v13, 0.0 }
 0x1ed   :  { %v191_v20 = vsel %vm189_vm4, %v186_v17, 0.0  ;;  %v202_v21 = vmul.f32 %v186_v17, %v186_v17  ;;  %v203_v23 = vsel %vm189_vm4, %v201_v16, 0.0 }
 0x1ee   :  { %v192_v22 = vadd.f32 %v191_v20, %v190_v19 }
 0x1ef   :  { %v204_v24 = vsel %vm189_vm4, %v202_v21, 0.0 }
 0x1f0   :  { %v193_v25 = vrot.slane %v192_v22, 4  ;;  %v205_v26 = vadd.f32 %v204_v24, %v203_v23 }
 0x1f2   :  { %v194_v27 = vadd.f32 %v193_v25, %v192_v22  ;;  %v206_v28 = vrot.slane %v205_v26, 4 }
 0x1f4   :  { %v195_v29 = vrot.slane %v194_v27, 2  ;;  %v207_v30 = vadd.f32 %v206_v28, %v205_v26 }
 0x1f6   :  { %v196_v31 = vadd.f32 %v195_v29, %v194_v27  ;;  %v208_v32 = vrot.slane %v207_v30, 2 }
 0x1f8   :  { %v197_v33 = vrot.slane %v196_v31, 1  ;;  %v209_v34 = vadd.f32 %v208_v32, %v207_v30 }
 0x1fa   :  { %v198_v35 = vadd.f32 %v197_v33, %v196_v31  ;;  %v210_v36 = vrot.slane %v209_v34, 1 }
 0x1fc   :  { %v200_v37 = vmul.f32 0.0625, %v198_v35  ;;  %v211_v38 = vadd.f32 %v210_v36, %v209_v34 }
 0x1fe   :  { %v212_v39 = vmul.f32 0.0625, %v211_v38  ;;  %v213_v40 = vmul.f32 %v200_v37, %v200_v37  ;;  %v219_v41 = vsub.f32 %v183_v13, %v200_v37  ;;  %v220_v42 = vsub.f32 %v186_v17, %v200_v37 }
 0x200   :  { %v214_v43 = vsub.f32 %v212_v39, %v213_v40 }
 0x202   :  { %v215_v44 = vadd.f32 1e-05, %v214_v43 }
 0x204   :  { %453 = vrsqrt.f32 %v215_v44 }
 0x20e   :  { %v454_v49 = vpop.eup %453 }
 0x20f   :  { %v218_v50 = vmul.f32 %v454_v49, %v217_v47 }
 0x211   :  { %v224_v51 = vrot.slane %v218_v50, %v223_v48 }
 0x213   :  { %v225_v53 = vmul.f32 %v224_v51, %v219_v41  ;;  %v226_v54 = vmul.f32 %v224_v51, %v220_v42 }
 0x215   :  { %v235_v55 = vadd.f32 %v398_v52, %v226_v54  ;;  %v234_v56 = vadd.f32 %v398_v52, %v225_v53 }
 0x217   :  { %v236_v57 = vmax.f32 %v234_v56, 0.0  ;;  %v237_v58 = vmax.f32 %v235_v55, 0.0 }
 0x219   :  { %v238_v59 = vpack.c.bf16 %v237_v58, %v236_v57 }
 0x21b   :  { %426 = vmatpush3.bf16.msra.mxu0 %v238_v59 }
 0x21e   :  { %428 = vmatmul.mubr.msk.bf16.vlgmr.msra.gmra.mrb[4].mxu0 %vm86_vm1, %v665_v2 }
 0x2f1   :  { %v273_v61 = vpop.f32.mrb[4].mxu0 }
 0x2f2   :  { %v429_v62 = vpop.f32.mrb[5].mxu0 }
 0x2f3   :  { %v276_v63 = vpop.f32.mrb[6].mxu0 }
 0x2f4   :  { %v280_v0 = vpack.c.bf16 %v276_v63, %v273_v61  ;;  %v430_v1 = vpop.f32.mrb[7].mxu0 }
 0x2f6   :  { %436 = vmatmul.mubr.msk.bf16.vlgmr.msra.gmra.mrb[4].mxu1 %vm189_vm4, %v280_v0 }
 0x3c9   :  { %v341_v5 = vpop.f32.mrb[4].mxu1 }
 0x3ca   :  { %v342_v2 = vadd.f32 %v400_v4, %v341_v5  ;;  %v437_v6 = vpop.f32.mrb[5].mxu1 }
 0x3cb   :  { %v344_v7 = vpop.f32.mrb[6].mxu1 }
 0x3cc   :  { %v345_v8 = vadd.f32 %v400_v4, %v344_v7  ;;  %v438_v9 = vpop.f32.mrb[7].mxu1  ;;  %v351_v10 = vsel %vm350_vm5, %v342_v2, -1e+30 }
 0x3cd   :  { %353 = vmax.xlane.f32.xlu0 %v351_v10 }
 0x3ce   :  { %v352_v11 = vsel %vm350_vm5, %v345_v8, -1e+30 }
 0x3d1   :  { %355 = vmax.xlane.f32.xlu0 %v352_v11 }
 0x45a   :  { %v354_v12 = vpop.xlane.xlu0 %353 }
 0x45b   :  { %v357_v13 = vsub.f32 %v351_v10, %v354_v12 }
 0x45d   :  { %v359_v14 = vmul.f32 1.442695, %v357_v13 }
 0x45e   :  { %v356_v15 = vpop.xlane.xlu0 %355 }
 0x45f   :  { %v358_v16 = vsub.f32 %v352_v11, %v356_v15  ;;  %455 = vpow2.f32 %v359_v14 }
 0x461   :  { %v361_v17 = vmul.f32 1.442695, %v358_v16 }
 0x463   :  { %457 = vpow2.f32 %v361_v17 }
 0x469   :  { %v456_v18 = vpop.eup %455 }
 0x46a   :  { %363 = vadd.xlane.f32.xlu1 %v456_v18 }
 0x46d   :  { %v458_v19 = vpop.eup %457 }
 0x46e   :  { %365 = vadd.xlane.f32.xlu1 %v458_v19 }
 0x4f7   :  { %v364_v20 = vpop.xlane.xlu1 %363 }
 0x4f8   :  { %459 = vlog2.f32 %v364_v20 }
 0x4fb   :  { %v366_v21 = vpop.xlane.xlu1 %365 }
 0x4fc   :  { %461 = vlog2.f32 %v366_v21 }
 0x502   :  { %v460_v22 = vpop.eup %459 }
 0x503   :  { %v368_v23 = vmul.f32 0.6931472, %v460_v22 }
 0x505   :  { %v371_v24 = vsub.f32 %v357_v13, %v368_v23 }
 0x506   :  { %v462_v25 = vpop.eup %461 }
 0x507   :  { %373 = vst [vmem:[#allocation8] sm:$0xff] %v371_v24  ;;  %v370_v26 = vmul.f32 0.6931472, %v462_v25 }
 0x509   :  { %v372_v27 = vsub.f32 %v358_v16, %v370_v26 }
 0x50b   :  { %374 = vst [vmem:[#allocation8 + $0x8] sm:$0xff] %v372_v27 }
 0x50c   :  { %540 = shalt.err (!%p537_p0)
}
 0x50d   :  { %s541_s6 = scalar_lea.hbm %s714_s9, 256 }
 0x50e   :  { %p542_p1 = scmp.ne.s32.totalorder %s714_s9, %s541_s6  ;;  %p545_p2 = scmp.lt.u32.totalorder %s541_s6, %s714_s9 }
 0x510   :  { %p547_p3 = pnand %p545_p2, %p542_p1 }
 0x512   :  { %550 = shalt.err (!%p547_p3)
}
 0x513   :  { %s565_s17 = smov 128   ;;  %s566_s18 = smov 8  }
 0x514   :  { %386 = dma.vmem_to_hbm [thread:$0]  %s381_s8, 256, %s714_s9, [#allocation4], %s565_s17, %s565_s17, %s566_s18  }
 0x515   :  { %555 = dma.done.wait [#allocation4], 256  }
 0x516   :  { %556 = vsyncadd [#allocation4], 4294967040 }
 0x517   :  { %390 = vsyncpa [#allocation3], 1 }
 0x518   :  { %391 = vsyncpa [#allocation6], 1 }
 0x519   :  { %392 = vsyncpa [#allocation4], 1 }

</bundles_post_ra>
